<compile_context>
chip_gen: v6e
topology: v6e:2x2x1
jax: 0.10.0
libtpu: 0.0.40
codegen_flags: <defaults>
</compile_context>

<pallas_src>
import functools

import jax
import jax.numpy as jnp
from jax.experimental import pallas as pl
from jax.experimental.pallas import tpu as pltpu


def _ce2d_kernel(logits_ref, tgt_ref, w_ref, loss_out_ref, wsum_out_ref,
                 loss_acc, wsum_acc, *, ignore_label, hw, has_weight):
    pi = pl.program_id(1)   # pixel-tile index (reduction axis, innermost)

    # Re-init the lane-partial accumulators at the start of every batch row:
    # required for correctness once the batch axis is "parallel" (each core
    # owns whole ni values and its own scratch).
    @pl.when(pi == 0)
    def _init():
        loss_acc[...] = jnp.zeros_like(loss_acc)
        wsum_acc[...] = jnp.zeros_like(wsum_acc)

    logits = logits_ref[0].astype(jnp.float32)     # (c, tile_hw) classes x pixels
    tgt = tgt_ref[0]                               # (1, tile_hw) int32

    c, tile_hw = logits.shape

    # Valid-pixel mask: not ignore / not negative / inside the real hw extent
    # (handles the ragged last tile without any wrapper-side padding).
    lane = jax.lax.broadcasted_iota(jnp.int32, (1, tile_hw), 1)
    pix = pi * tile_hw + lane
    valid = jnp.logical_and(
        jnp.logical_and(tgt >= 0, tgt != ignore_label), pix < hw)   # (1, tile_hw)
    tgt_safe = jnp.where(valid, tgt, 0)

    # Numerically-stable log-sum-exp over the class (sublane) axis.  No
    # materialized z: the subtract fuses into the EUP exp pass.
    m = jnp.max(logits, axis=0, keepdims=True)                       # (1, tile_hw)
    sum_exp = jnp.sum(jnp.exp(logits - m), axis=0, keepdims=True)    # (1, tile_hw)
    lse = jnp.log(sum_exp)                                           # (1, tile_hw)

    # Target-class logit via one-hot compare on a class iota (no dynamic
    # gather on TPU), taken from the RAW logits.
    c_iota = jax.lax.broadcasted_iota(jnp.int32, (c, tile_hw), 0)
    onehot = c_iota == tgt_safe                                       # (c, tile_hw) bool

    logit_t = jnp.sum(jnp.where(onehot, logits, 0.0), axis=0, keepdims=True)
    nll = lse + m - logit_t                                           # (1, tile_hw)

    if has_weight:
        wvec = w_ref[...].astype(jnp.float32)                         # (c, 1)
        w_i = jnp.sum(jnp.where(onehot, wvec, 0.0), axis=0, keepdims=True)
        loss_term = nll * w_i
        wsum_term = w_i
    else:
        # Unweighted fast path: skip the (c, tile) weight pass + its reduce.
        loss_term = nll
        wsum_term = jnp.ones_like(nll)

    # Select (not multiply) so garbage in out-of-bounds tail columns (possibly
    # NaN/Inf) never reaches the sums.
    loss_acc[...] += jnp.where(valid, loss_term, 0.0)
    wsum_acc[...] += jnp.where(valid, wsum_term, 0.0)

    # Per-batch epilogue: one cross-lane reduce, splat-stored into this
    # batch's (1, 1, 128) partial-output block.
    @pl.when(pi == pl.num_programs(1) - 1)
    def _finalize():
        loss_out_ref[...] = jnp.full((1, 1, 128), jnp.sum(loss_acc[...]),
                                     jnp.float32)
        wsum_out_ref[...] = jnp.full((1, 1, 128), jnp.sum(wsum_acc[...]),
                                     jnp.float32)


def _round_up(x, m):
    return ((x + m - 1) // m) * m


def cross_entropy_2d(predict, target, weight=None, *, ignore_label=255,
                     tile_pixels=None):
    """JAX/Pallas equivalent of CrossEntropy2d.forward.

    predict: (n, c, h, w) float (f32 or bf16; bf16 stays bf16 over the DMA)
    target:  (n, h, w)    int
    weight:  optional (c,) per-class weight
    Returns scalar mean cross-entropy over non-ignored pixels (weighted mean
    when `weight` is given), 0.0 if there is no valid pixel.
    """
    n, c, h, w = predict.shape
    assert target.shape == (n, h, w)
    hw = h * w

    # Free layout changes only: contiguous reshape, no transpose, no pad.
    logits = predict.reshape(n, c, hw)
    tgt = target.reshape(n, 1, hw).astype(jnp.int32)

    has_weight = weight is not None
    if has_weight:
        weight_arr = jnp.asarray(weight, jnp.float32).reshape(c, 1)
    else:
        weight_arr = jnp.ones((c, 1), jnp.float32)   # tiny resident block, unused

    # --- Generation-aware VMEM budgets -------------------------------------
    try:
        vmem_cap = int(getattr(pltpu.get_tpu_info(), "vmem_capacity_bytes",
                               128 * 1024 * 1024))
    except Exception:
        vmem_cap = 128 * 1024 * 1024
    if vmem_cap <= 64 * 1024 * 1024:
        # v7x-class: 64 MiB physical per TensorCore.
        vmem_limit = 32 * 1024 * 1024
        vmem_budget = 20 * 1024 * 1024
    else:
        # v5e / v6e: 128 MiB physical VMEM.
        vmem_limit = 64 * 1024 * 1024
        vmem_budget = 40 * 1024 * 1024

    # --- Tile sizing ---------------------------------------------------------
    # Per-pixel live VMEM bytes: double-buffered logits slab + ~5 f32 (c,tile)
    # intermediates (exp, one-hot selects, ...) + double-buffered int32 targets
    # + two f32 lane accumulators.
    itemsize = jnp.dtype(predict.dtype).itemsize
    per_pixel = c * (2 * itemsize + 5 * 4) + 2 * 4 + 2 * 4
    max_tile_by_vmem = max(128, ((vmem_budget // per_pixel) // 128) * 128)

    if tile_pixels is None:
        tile_pixels = 32768   # big default; real cap comes from VMEM / hw
    tile_hw = min(_round_up(tile_pixels, 128), _round_up(hw, 128),
                  max_tile_by_vmem)
    num_tiles = pl.cdiv(hw, tile_hw)
    grid = (n, num_tiles)

    loss_part, wsum_part = pl.pallas_call(
        functools.partial(_ce2d_kernel, ignore_label=ignore_label, hw=hw,
                          has_weight=has_weight),
        out_shape=(jax.ShapeDtypeStruct((n, 1, 128), jnp.float32),
                   jax.ShapeDtypeStruct((n, 1, 128), jnp.float32)),
        grid_spec=pltpu.PrefetchScalarGridSpec(
            num_scalar_prefetch=0,
            grid=grid,
            in_specs=[
                # logits tile: (1, c, tile_hw) — classes on sublanes, pixels on lanes
                pl.BlockSpec((1, c, tile_hw), lambda ni, pi: (ni, 0, pi)),
                # target tile: (1, 1, tile_hw) — lane-dense int32
                pl.BlockSpec((1, 1, tile_hw), lambda ni, pi: (ni, 0, pi)),
                # class weights, resident
                pl.BlockSpec((c, 1), lambda ni, pi: (0, 0)),
            ],
            out_specs=[
                # Per-batch partial sums -> safe under a parallel batch axis.
                pl.BlockSpec((1, 1, 128), lambda ni, pi: (ni, 0, 0)),
                pl.BlockSpec((1, 1, 128), lambda ni, pi: (ni, 0, 0)),
            ],
            scratch_shapes=[
                pltpu.VMEM((1, tile_hw), jnp.float32),   # per-lane loss partials
                pltpu.VMEM((1, tile_hw), jnp.float32),   # per-lane weight partials
            ],
        ),
        compiler_params=pltpu.CompilerParams(
            dimension_semantics=("parallel", "arbitrary"),
            vmem_limit_bytes=vmem_limit),
    )(logits, tgt, weight_arr)

    loss_sum = jnp.sum(loss_part[:, 0, 0])
    w_sum = jnp.sum(wsum_part[:, 0, 0])
    # PyTorch returns zeros(1) when there are no valid targets.
    return jnp.where(w_sum > 0, loss_sum / jnp.maximum(w_sum, 1e-30), 0.0)


def _reference(predict, target, weight=None, ignore_label=255):
    """Pure-JAX reference matching F.cross_entropy(..., reduction='mean')."""
    n, c, h, w = predict.shape
    logits = jnp.transpose(predict, (0, 2, 3, 1)).reshape(-1, c).astype(jnp.float32)
    tgt = target.reshape(-1).astype(jnp.int32)
    valid = (tgt >= 0) & (tgt != ignore_label)
    tgt_safe = jnp.where(valid, tgt, 0)
    logp = jax.nn.log_softmax(logits, axis=-1)
    nll = -jnp.take_along_axis(logp, tgt_safe[:, None], axis=-1)[:, 0]
    if weight is None:
        weight = jnp.ones((c,), jnp.float32)
    w_i = jnp.asarray(weight, jnp.float32)[tgt_safe]
    validf = valid.astype(jnp.float32)
    num = jnp.sum(nll * w_i * validf)
    den = jnp.sum(w_i * validf)
    return jnp.where(den > 0, num / jnp.maximum(den, 1e-30), 0.0)


if __name__ == "__main__":
    key = jax.random.PRNGKey(0)
    k1, k2, k3, k4, k5, k6, k7, k8 = jax.random.split(key, 8)

    ignore_label = 255

    # Test 1: f32, unweighted fast path, hw divisible by the tile.
    n, c, h, w = 2, 4, 16, 16
    predict = jax.random.normal(k1, (n, c, h, w), jnp.float32)
    target = jax.random.randint(k2, (n, h, w), 0, c).astype(jnp.int32)
    ignore_mask = jax.random.bernoulli(k3, 0.2, (n, h, w))
    target = jnp.where(ignore_mask, ignore_label, target)

    loss = jax.block_until_ready(
        cross_entropy_2d(predict, target, ignore_label=ignore_label))
    ref = _reference(predict, target, ignore_label=ignore_label)
    assert jnp.allclose(loss, ref, atol=1e-5, rtol=1e-5), (loss, ref)

    # Test 2: class weights + ragged pixel tiling (hw not a multiple of tile).
    n2, c2, h2, w2 = 2, 3, 16, 20   # hw = 320 -> tiles of 128, last ragged
    predict2 = jax.random.normal(k4, (n2, c2, h2, w2), jnp.float32)
    target2 = jax.random.randint(k5, (n2, h2, w2), 0, c2).astype(jnp.int32)
    target2 = target2.at[0, :2, :].set(ignore_label)
    wvec = jnp.array([0.5, 1.0, 2.0], jnp.float32)
    loss2 = jax.block_until_ready(
        cross_entropy_2d(predict2, target2, weight=wvec,
                         ignore_label=ignore_label, tile_pixels=128))
    ref2 = _reference(predict2, target2, weight=wvec,
                      ignore_label=ignore_label)
    assert jnp.allclose(loss2, ref2, atol=1e-5, rtol=1e-5), (loss2, ref2)

    # Test 3: bf16 logits pass through the DMA unpromoted.
    predict_bf16 = predict.astype(jnp.bfloat16)
    loss3 = jax.block_until_ready(
        cross_entropy_2d(predict_bf16, target, ignore_label=ignore_label))
    ref3 = _reference(predict_bf16, target, ignore_label=ignore_label)
    assert jnp.allclose(loss3, ref3, atol=1e-4, rtol=1e-4), (loss3, ref3)

    # Test 4: all pixels ignored -> 0.0 (matches torch.zeros(1)).
    target4 = jnp.full((n, h, w), ignore_label, jnp.int32)
    loss4 = jax.block_until_ready(
        cross_entropy_2d(predict, target4, ignore_label=ignore_label))
    assert jnp.allclose(loss4, 0.0), loss4

    # Test 5: larger class count (segmentation-style head) + weights.
    n5, c5, h5, w5 = 2, 19, 16, 16
    predict5 = jax.random.normal(k6, (n5, c5, h5, w5), jnp.float32)
    target5 = jax.random.randint(k7, (n5, h5, w5), 0, c5).astype(jnp.int32)
    ignore5 = jax.random.bernoulli(k8, 0.3, (n5, h5, w5))
    target5 = jnp.where(ignore5, ignore_label, target5)
    wvec5 = jnp.linspace(0.5, 2.0, c5).astype(jnp.float32)
    loss5 = jax.block_until_ready(
        cross_entropy_2d(predict5, target5, weight=wvec5,
                         ignore_label=ignore_label))
    ref5 = _reference(predict5, target5, weight=wvec5,
                      ignore_label=ignore_label)
    assert jnp.allclose(loss5, ref5, atol=1e-5, rtol=1e-5), (loss5, ref5)

    print("KERNEL_OK")
</pallas_src>

<mosaic_0001>
module attributes {stable_mosaic.version = 11 : i64} {
  func.func @_ce2d_kernel(%arg0: i32, %arg1: i32, %arg2: memref<1x4x256xf32, #tpu.memory_space<vmem>>, %arg3: memref<1x1x256xi32, #tpu.memory_space<vmem>>, %arg4: memref<4x1xf32, #tpu.memory_space<vmem>>, %arg5: memref<1x1x128xf32, #tpu.memory_space<vmem>>, %arg6: memref<1x1x128xf32, #tpu.memory_space<vmem>>, %arg7: memref<1x256xf32, #tpu.memory_space<vmem>>, %arg8: memref<1x256xf32, #tpu.memory_space<vmem>>) attributes {dimension_semantics = [#tpu.dimension_semantics<parallel>, #tpu.dimension_semantics<arbitrary>], iteration_bounds = array<i64: 2, 1>, scalar_prefetch = 0 : i64, scratch_operands = 2 : i64, tpu.core_type = #tpu.core_type<tc>, window_params = [{transform_indices = @transform_0, window_bounds = array<i64: 1, 4, 256>}, {transform_indices = @transform_1, window_bounds = array<i64: 1, 1, 256>}, {pipeline_mode = #tpu.pipeline_mode<synchronous>, transform_indices = @transform_2, window_bounds = array<i64: 4, 1>}, {transform_indices = @transform_3, window_bounds = array<i64: 1, 1, 128>}, {transform_indices = @transform_4, window_bounds = array<i64: 1, 1, 128>}]} {
    %c0_i32 = arith.constant 0 : i32
    %0 = arith.cmpi eq, %arg1, %c0_i32 : i32
    %1 = arith.extui %0 : i1 to i32
    %c0_i32_0 = arith.constant 0 : i32
    %2 = arith.cmpi ne, %1, %c0_i32_0 : i32
    scf.if %2 {
      %cst_25 = arith.constant 0.000000e+00 : f32
      %52 = vector.broadcast %cst_25 : f32 to vector<1x256xf32>
      %c0_26 = arith.constant 0 : index
      %c0_27 = arith.constant 0 : index
      %53 = vector.load %arg7[%c0_26, %c0_27] : memref<1x256xf32, #tpu.memory_space<vmem>>, vector<1x256xf32>
      tpu.vector_store %arg7[%c0_26, %c0_27], %52 {strides = array<i32>} : memref<1x256xf32, #tpu.memory_space<vmem>>, vector<1x256xf32>,
      %cst_28 = arith.constant 0.000000e+00 : f32
      %54 = vector.broadcast %cst_28 : f32 to vector<1x256xf32>
      %c0_29 = arith.constant 0 : index
      %c0_30 = arith.constant 0 : index
      %55 = vector.load %arg8[%c0_29, %c0_30] : memref<1x256xf32, #tpu.memory_space<vmem>>, vector<1x256xf32>
      tpu.vector_store %arg8[%c0_29, %c0_30], %54 {strides = array<i32>} : memref<1x256xf32, #tpu.memory_space<vmem>>, vector<1x256xf32>,
    } else {
    }
    %c0 = arith.constant 0 : index
    %c0_1 = arith.constant 0 : index
    %c0_2 = arith.constant 0 : index
    %3 = vector.load %arg2[%c0, %c0_1, %c0_2] : memref<1x4x256xf32, #tpu.memory_space<vmem>>, vector<1x4x256xf32>
    %4 = vector.shape_cast %3 : vector<1x4x256xf32> to vector<4x256xf32>
    %c0_3 = arith.constant 0 : index
    %c0_4 = arith.constant 0 : index
    %c0_5 = arith.constant 0 : index
    %5 = vector.load %arg3[%c0_3, %c0_4, %c0_5] : memref<1x1x256xi32, #tpu.memory_space<vmem>>, vector<1x1x256xi32>
    %6 = vector.shape_cast %5 : vector<1x1x256xi32> to vector<1x256xi32>
    %7 = tpu.iota {dimensions = array<i32: 1>} : vector<1x256xi32>
    %c256_i32 = arith.constant 256 : i32
    %8 = arith.muli %arg1, %c256_i32 : i32
    %9 = vector.broadcast %8 : i32 to vector<1x256xi32>
    %10 = arith.addi %9, %7 : vector<1x256xi32>
    %c0_i32_6 = arith.constant 0 : i32
    %11 = vector.broadcast %c0_i32_6 : i32 to vector<1x256xi32>
    %12 = arith.cmpi sge, %6, %11 : vector<1x256xi32>
    %c255_i32 = arith.constant 255 : i32
    %13 = vector.broadcast %c255_i32 : i32 to vector<1x256xi32>
    %14 = arith.cmpi ne, %6, %13 : vector<1x256xi32>
    %15 = arith.andi %12, %14 : vector<1x256xi1>
    %c256_i32_7 = arith.constant 256 : i32
    %16 = vector.broadcast %c256_i32_7 : i32 to vector<1x256xi32>
    %17 = arith.cmpi slt, %10, %16 : vector<1x256xi32>
    %18 = arith.andi %15, %17 : vector<1x256xi1>
    %c0_i32_8 = arith.constant 0 : i32
    %19 = vector.broadcast %c0_i32_8 : i32 to vector<1x256xi32>
    %20 = arith.select %18, %6, %19 : vector<1x256xi1>, vector<1x256xi32>
    %cst = arith.constant dense<0xFF800000> : vector<256xf32>
    %21 = vector.multi_reduction <maximumf>, %4, %cst [0] : vector<4x256xf32> to vector<256xf32>
    %22 = vector.shape_cast %21 : vector<256xf32> to vector<1x256xf32>
    %23 = vector.broadcast %22 : vector<1x256xf32> to vector<4x256xf32>
    %24 = arith.subf %4, %23 : vector<4x256xf32>
    %25 = math.exp %24 : vector<4x256xf32>
    %cst_9 = arith.constant dense<0.000000e+00> : vector<256xf32>
    %26 = vector.multi_reduction <add>, %25, %cst_9 [0] : vector<4x256xf32> to vector<256xf32>
    %27 = vector.shape_cast %26 : vector<256xf32> to vector<1x256xf32>
    %28 = math.log %27 : vector<1x256xf32>
    %29 = tpu.iota {dimensions = array<i32: 0>} : vector<4x256xi32>
    %30 = vector.broadcast %20 : vector<1x256xi32> to vector<4x256xi32>
    %31 = arith.cmpi eq, %29, %30 : vector<4x256xi32>
    %cst_10 = arith.constant 0.000000e+00 : f32
    %32 = vector.broadcast %cst_10 : f32 to vector<4x256xf32>
    %33 = arith.select %31, %4, %32 : vector<4x256xi1>, vector<4x256xf32>
    %cst_11 = arith.constant dense<0.000000e+00> : vector<256xf32>
    %34 = vector.multi_reduction <add>, %33, %cst_11 [0] : vector<4x256xf32> to vector<256xf32>
    %35 = vector.shape_cast %34 : vector<256xf32> to vector<1x256xf32>
    %36 = arith.addf %28, %22 : vector<1x256xf32>
    %37 = arith.subf %36, %35 : vector<1x256xf32>
    %cst_12 = arith.constant 1.000000e+00 : f32
    %38 = vector.broadcast %cst_12 : f32 to vector<1x256xf32>
    %c0_13 = arith.constant 0 : index
    %c0_14 = arith.constant 0 : index
    %39 = vector.load %arg7[%c0_13, %c0_14] : memref<1x256xf32, #tpu.memory_space<vmem>>, vector<1x256xf32>
    %cst_15 = arith.constant 0.000000e+00 : f32
    %40 = vector.broadcast %cst_15 : f32 to vector<1x256xf32>
    %41 = arith.select %18, %37, %40 : vector<1x256xi1>, vector<1x256xf32>
    %42 = arith.addf %39, %41 : vector<1x256xf32>
    %c0_16 = arith.constant 0 : index
    %c0_17 = arith.constant 0 : index
    %43 = vector.load %arg7[%c0_16, %c0_17] : memref<1x256xf32, #tpu.memory_space<vmem>>, vector<1x256xf32>
    tpu.vector_store %arg7[%c0_16, %c0_17], %42 {strides = array<i32>} : memref<1x256xf32, #tpu.memory_space<vmem>>, vector<1x256xf32>,
    %c0_18 = arith.constant 0 : index
    %c0_19 = arith.constant 0 : index
    %44 = vector.load %arg8[%c0_18, %c0_19] : memref<1x256xf32, #tpu.memory_space<vmem>>, vector<1x256xf32>
    %cst_20 = arith.constant 0.000000e+00 : f32
    %45 = vector.broadcast %cst_20 : f32 to vector<1x256xf32>
    %46 = arith.select %18, %38, %45 : vector<1x256xi1>, vector<1x256xf32>
    %47 = arith.addf %44, %46 : vector<1x256xf32>
    %c0_21 = arith.constant 0 : index
    %c0_22 = arith.constant 0 : index
    %48 = vector.load %arg8[%c0_21, %c0_22] : memref<1x256xf32, #tpu.memory_space<vmem>>, vector<1x256xf32>
    tpu.vector_store %arg8[%c0_21, %c0_22], %47 {strides = array<i32>} : memref<1x256xf32, #tpu.memory_space<vmem>>, vector<1x256xf32>,
    %c0_i32_23 = arith.constant 0 : i32
    %49 = arith.cmpi eq, %arg1, %c0_i32_23 : i32
    %50 = arith.extui %49 : i1 to i32
    %c0_i32_24 = arith.constant 0 : i32
    %51 = arith.cmpi ne, %50, %c0_i32_24 : i32
    scf.if %51 {
      %c0_25 = arith.constant 0 : index
      %c0_26 = arith.constant 0 : index
      %52 = vector.load %arg7[%c0_25, %c0_26] : memref<1x256xf32, #tpu.memory_space<vmem>>, vector<1x256xf32>
      %53 = vector.shape_cast %52 : vector<1x256xf32> to vector<1x1x256xf32>
      %cst_27 = arith.constant dense<0.000000e+00> : vector<1xf32>
      %54 = vector.multi_reduction <add>, %53, %cst_27 [1, 2] : vector<1x1x256xf32> to vector<1xf32>
      %55 = vector.shape_cast %54 : vector<1xf32> to vector<1x1x1xf32>
      %56 = vector.extract %55[0, 0, 0] : f32 from vector<1x1x1xf32>
      %57 = vector.broadcast %56 : f32 to vector<1x1x128xf32>
      %c0_28 = arith.constant 0 : index
      %c0_29 = arith.constant 0 : index
      %c0_30 = arith.constant 0 : index
      %58 = vector.load %arg5[%c0_28, %c0_29, %c0_30] : memref<1x1x128xf32, #tpu.memory_space<vmem>>, vector<1x1x128xf32>
      tpu.vector_store %arg5[%c0_28, %c0_29, %c0_30], %57 {strides = array<i32>} : memref<1x1x128xf32, #tpu.memory_space<vmem>>, vector<1x1x128xf32>,
      %c0_31 = arith.constant 0 : index
      %c0_32 = arith.constant 0 : index
      %59 = vector.load %arg8[%c0_31, %c0_32] : memref<1x256xf32, #tpu.memory_space<vmem>>, vector<1x256xf32>
      %60 = vector.shape_cast %59 : vector<1x256xf32> to vector<1x1x256xf32>
      %cst_33 = arith.constant dense<0.000000e+00> : vector<1xf32>
      %61 = vector.multi_reduction <add>, %60, %cst_33 [1, 2] : vector<1x1x256xf32> to vector<1xf32>
      %62 = vector.shape_cast %61 : vector<1xf32> to vector<1x1x1xf32>
      %63 = vector.extract %62[0, 0, 0] : f32 from vector<1x1x1xf32>
      %64 = vector.broadcast %63 : f32 to vector<1x1x128xf32>
      %c0_34 = arith.constant 0 : index
      %c0_35 = arith.constant 0 : index
      %c0_36 = arith.constant 0 : index
      %65 = vector.load %arg6[%c0_34, %c0_35, %c0_36] : memref<1x1x128xf32, #tpu.memory_space<vmem>>, vector<1x1x128xf32>
      tpu.vector_store %arg6[%c0_34, %c0_35, %c0_36], %64 {strides = array<i32>} : memref<1x1x128xf32, #tpu.memory_space<vmem>>, vector<1x1x128xf32>,
    } else {
    }
    return
  }
  func.func @transform_0(%arg0: i32, %arg1: i32) -> (i32, i32, i32) {
    %c0_i32 = arith.constant 0 : i32
    %c0_i32_0 = arith.constant 0 : i32
    return %arg0, %c0_i32, %arg1 : i32, i32, i32
  }
  func.func @transform_1(%arg0: i32, %arg1: i32) -> (i32, i32, i32) {
    %c0_i32 = arith.constant 0 : i32
    %c0_i32_0 = arith.constant 0 : i32
    return %arg0, %c0_i32, %arg1 : i32, i32, i32
  }
  func.func @transform_2(%arg0: i32, %arg1: i32) -> (i32, i32) {
    %c0_i32 = arith.constant 0 : i32
    %c0_i32_0 = arith.constant 0 : i32
    %c0_i32_1 = arith.constant 0 : i32
    return %c0_i32, %c0_i32_0 : i32, i32
  }
  func.func @transform_3(%arg0: i32, %arg1: i32) -> (i32, i32, i32) {
    %c0_i32 = arith.constant 0 : i32
    %c0_i32_0 = arith.constant 0 : i32
    %c0_i32_1 = arith.constant 0 : i32
    return %arg0, %c0_i32, %c0_i32_0 : i32, i32, i32
  }
  func.func @transform_4(%arg0: i32, %arg1: i32) -> (i32, i32, i32) {
    %c0_i32 = arith.constant 0 : i32
    %c0_i32_0 = arith.constant 0 : i32
    %c0_i32_1 = arith.constant 0 : i32
    return %arg0, %c0_i32, %c0_i32_0 : i32, i32, i32
  }
}

</mosaic_0001>

<bundles_post_ra>
// kernel: tpu_custom_call.1
= control target key start
LH: loop header
LB: loop body
LE: loop exit
PB: predicated region body
PF: predicated region fallthrough
CT: control target
= control target key end

     0   :  { %10 = vsyncpa [#allocation5], 0  ;;  %s1125_s0 = inlined_call_operand.hbm [shape: f32[2,4,256], index: 0, kind: input, shape index: {}]   ;;  %s1126_s1 = inlined_call_operand.vmem [shape: s32[2,1,256], index: 1, kind: input, shape index: {}]   ;;  %s1127_s2 = inlined_call_operand.vmem [shape: f32[4,1], index: 2, kind: input, shape index: {}]   ;;  %s1128_s3 = inlined_call_operand.hbm [shape: f32[2,1,128], index: 3, kind: output, shape index: {0}]   ;;  %s1129_s4 = inlined_call_operand.hbm [shape: f32[2,1,128], index: 4, kind: output, shape index: {1}]  }
   0x1   :  { %12 = vsyncpa [#allocation5 + $0x1], 0 }
   0x2   :  { %13 = vsyncpa [#allocation6], 0 }
   0x3   :  { %15 = vsyncpa [#allocation6 + $0x1], 0 }
   0x4   :  { %16 = vsyncpa [#allocation9], 0 }
   0x5   :  { %18 = vsyncpa [#allocation9 + $0x1], 0  ;;  %s898_s15 = smov 0   ;;  %s900_s16 = smov 0  }
   0x6   :  { %s902_s17 = smov 0   ;;  %s904_s18 = smov 0  }
   0x7   :  { %s906_s2 = smov 0   ;;  %s908_s19 = smov 0  }
   0x8 LB: > { %s631_s20 = sadd.s32 4294967295, %s865_s19   ;;  %s632_s21 = sadd.s32 4294967294, %s865_s19   ;;  %s865_s19 = sphi %s908_s19, %s24_s19   ;;  %s861_s2 = sphi %s906_s2, %s1145_s2   ;;  %s857_s18 = sphi %s904_s18, %s1144_s18   ;;  %s853_s17 = sphi %s902_s17, %s1143_s17   ;;  %s849_s16 = sphi %s900_s16, %s1142_s16   ;;  %s845_s15 = sphi %s898_s15, %s1141_s15  }
   0x9   : > { %s36_s22 = sadd.s32 1, %s861_s2  ;;  %s45_s23 = sadd.s32 1, %s853_s17 }
   0xa   : > { %p38_p0 = scmp.ge.s32.totalorder %s36_s22, 2  ;;  %p52_p1 = scmp.ne.s32.totalorder %s853_s17, %s849_s16 }
   0xb   : > { %p53_p2 = scmp.eq.s32.totalorder %s865_s19, 0  ;;  %p58_p3 = scmp.ne.s32.totalorder %s849_s16, %s845_s15 }
   0xc   : > { %s1147_s22 = smov (%p38_p0, %s36_s22), 0  ;;  %p59_p5 = scmp.eq.s32.totalorder %s631_s20, 0 }
   0xd   : > { %p939_p4 = por %p53_p2, %p52_p1  ;;  %s40_s25 = ssub.s32 %s861_s2, %s1147_s22 }
   0xe   : > { %p131_p6 = scmp.eq.s32.totalorder %s631_s20, 1  ;;  %p43_p7 = scmp.eq.s32.totalorder %s40_s25, 0 }
   0xf   : > { %p945_p8 = por %p59_p5, %p58_p3  ;;  %p137_p10 = scmp.eq.s32.totalorder %s632_s21, 1 }
  0x10   : > { %p949_p9 = por %p131_p6, %p52_p1  ;;  %p667_p13 = scmp.lt.s32.totalorder %s865_s19, 2 }
  0x11   : > { %s954_s28 = scalar_select %p43_p7, %s853_s17, %s45_s23  }
  0x12   : > { %p956_p11 = por %p137_p10, %p58_p3  ;;  %s186_s30 = sand.u32 1, %s853_s17  }
  0x13   : > { %s635_s5 = sshll.u32 %s186_s30, 3  ;;  %s645_s6 = sshll.u32 %s861_s2, 7 }
  0x14   : > { %s1133_s29 = scalar_select %p956_p11, 1, 0 }
  0x15   : > { %s198_s9 = scalar_lea.hbm %s1125_s0, %s645_s6  ;;  %s190_s10 = scalar_lea.vmem [#allocation4], %s635_s5 }
  0x16   : > { %s200_s11 = sshll.u32 %s190_s10, 4  ;;  %p969_p0 = pnand %p667_p13, %p939_p4  ;;  %s201_s11 = int_to_ptr.vmem [resolvable:$true] %s200_s11 }
  0x17   : > { %p638_p1 = scmp.ge.s32.totalorder %s865_s19, 1  ;;  %p217_p2 = scmp.lt.s32.totalorder %s865_s19, 3 }
  0x18   : > { %s187_s13 = scalar_lea.sflag [#allocation5], %s186_s30  ;;  %p729_p3 = pneg %p969_p0 }
  0x19   : > { %s740_s14 = scalar_lea.vmem %s201_s11, 128  ;;  %s867_s20 = smov [#allocation4]  }
  0x1a   : > { %p741_p5 = scmp.ne.s32.totalorder %s201_s11, %s740_s14  ;;  %s745_s21 = sshll.u32 %s867_s20, 4  ;;  %s746_s21 = int_to_ptr.vmem [resolvable:$false] %s745_s21 }
  0x1b   : > { %s747_s23 = scalar_lea.vmem %s746_s21, 256  ;;  %p748_p10 = scmp.lt.s32.totalorder %s201_s11, %s746_s21 }
  0x1c   : > { %p743_p6 = pnand %p741_p5, %p729_p3  ;;  %p749_p12 = scmp.lt.s32.totalorder %s747_s23, %s740_s14 }
  0x1e   : > { %p744_p7 = pneg %p743_p6  ;;  %p750_p4 = por %p749_p12, %p748_p10 }
  0x20   : > { %p751_p13 = pnand %p750_p4, %p744_p7 }
  0x22   : > { %754 = shalt.err (!%p751_p13)
}
  0x23   : > { %659 = dma.hbm_to_vmem [thread:$0]  (!%p969_p0), %s198_s9, 128, %s201_s11, %s187_s13  }
  0x24   : > { %p218_p11 = pnand %p638_p1, %p217_p2 }
  0x25   : > { %s984_s24 = sand.u32 (!%p218_p11), 1, %s849_s16  }
  0x26   : > { %221 = sbr.rel (%p218_p11) target bundleno = 376 (0x178), region = 32  ;;  %s639_s25 = sshll.u32 (!%p218_p11), %s984_s24, 3 }
  0x27   : > { %s224_s30 = scalar_lea.sflag (!%p218_p11), [#allocation5], %s984_s24  ;;  %s227_s5 = scalar_lea.vmem (!%p218_p11), [#allocation4], %s639_s25 }
  0x2b   : > { %832 = dma.done.wait (%p945_p8), %s224_s30, 128  }
  0x2c   : > { %834 = vsyncadd (%p945_p8), %s224_s30, 4294967168  ;;  %p265_p12 = scmp.lt.s32.totalorder %s857_s18, 1  ;;  %v277_v0 = vlaneseq  ;;  %v868_v1 = vmov 1966171168   ;;  %v869_v5 = vmov 0.0   ;;  %v870_v6 = vmov 1  }
  0x2d   : > { %v301_v2 = vunpack.c.l.s4 %v868_v1  ;;  %v299_v7 = vcombine.low %v870_v6, %v870_v6  ;;  %vm320_vm1 = vcmask 1043456   ;;  %v283_v10 = vld [vmem:[%s227_s5] sm:$0xff]  ;;  %vm440_vm9 = vcmask 1040384   ;;  %s641_s10 = sshll.u32 %s857_s18, 4  ;;  %s256_s11 = scalar_lea.vmem [#allocation7], %s984_s24 }
  0x2e   : > { %s266_s6 = scalar_select %p265_p12, %s857_s18, 1  ;;  %vm994_vm0 = vcmp.lt.s32.totalorder %v277_v0, 256  ;;  %v304_v4 = vshrl.u32 %v277_v0, 7  ;;  %v318_v13 = vcombine.high %v283_v10, %v283_v10  ;;  %v321_v14 = vsel %vm320_vm1, %v283_v10, -inf }
  0x2f   : > { %281 = vst.msk [vmem:[#allocation2] sm:$0x3] %vm994_vm0, %v869_v5  ;;  %282 = vst.msk [vmem:[#allocation3] sm:$0x3] %vm994_vm0, %v869_v5  ;;  %v302_v8 = vunpack.c.0.s8 %v301_v2  ;;  %v322_v16 = vrot.slane %v321_v14, 4  ;;  %s498_s12 = sshll.u32 %s256_s11, 4  ;;  %s1051_s23 = scalar_lea.hbm %s1128_s3, %s641_s10  ;;  %s1053_s12 = int_to_ptr.vmem [resolvable:$true] %s498_s12 }
  0x30   : > { %s640_s26 = sshll.u32 %s266_s6, 1  ;;  %v328_v17 = vsel %vm320_vm1, %v318_v13, -inf  ;;  %v1019_v36 = vsub.s32 0, %v304_v4  ;;  %v1023_v38 = vsub.s32 1, %v304_v4  ;;  %s262_s13 = scalar_lea.vmem [#allocation8], %s984_s24 }
  0x31   : > { %s271_s9 = scalar_lea.vmem %s1126_s1, %s640_s26  ;;  %v1005_v9 = vsub.s32 %v302_v8, %v304_v4  ;;  %v323_v18 = vmax.f32 %v321_v14, %v322_v16  ;;  %v329_v19 = vrot.slane %v328_v17, 4  ;;  %s511_s14 = sshll.u32 %s262_s13, 4  ;;  %s1055_s14 = int_to_ptr.vmem [resolvable:$true] %s511_s14 }
  0x32   : > { %v284_v11 = vld [vmem:[%s271_s9] sm:$0x3]  ;;  %s482_s30 = scalar_lea.sflag [#allocation6], %s984_s24  ;;  %s755_s5 = scalar_lea.vmem %s1053_s12, 16 }
  0x33   : > { %v306_v12 = vrot.slane %v299_v7, %v1005_v9  ;;  %vm292_vm2 = vcmp.ge.s32.totalorder %v284_v11, 0  ;;  %vm293_vm3 = vcmp.ne.s32.totalorder %v284_v11, 255  ;;  %v324_v22 = vrot.slane %v323_v18, 2  ;;  %p756_p8 = scmp.ne.s32.totalorder %s1053_s12, %s755_s5  ;;  %s871_s6 = smov [#allocation7]  }
  0x34   : > { %vm294_vm4 = vmand %vm292_vm2, %vm293_vm3  ;;  %v330_v23 = vmax.f32 %v328_v17, %v329_v19  ;;  %s759_s26 = sshll.u32 %s871_s6, 4  ;;  %s760_s26 = int_to_ptr.vmem [resolvable:$false] %s759_s26 }
  0x35   : > { %v313_v15 = vrot.slane %v306_v12, %v1005_v9  ;;  %v325_v26 = vmax.f32 %v323_v18, %v324_v22  ;;  %p757_p11 = pnand %p756_p8, %p949_p9  ;;  %s761_s7 = scalar_lea.vmem %s760_s26, 32 }
  0x36   : > { %v421_v20 = vld [vmem:[#allocation3] sm:$0x3]  ;;  %v331_v27 = vrot.slane %v330_v23, 2  ;;  %v395_v22 = vld [vmem:[#allocation2] sm:$0x3]  ;;  %p762_p1 = scmp.lt.s32.totalorder %s1053_s12, %s760_s26  ;;  %p763_p2 = scmp.lt.s32.totalorder %s761_s7, %s755_s5 }
  0x37   : > { %vm314_vm5 = vcmp.ne.s32.totalorder %v313_v15, 0  ;;  %v326_v28 = vrot.slane %v325_v26, 1  ;;  %p758_p0 = pneg %p757_p11 }
  0x38   : > { %vm1011_vm6 = vmand %vm294_vm4, %vm314_vm5  ;;  %v332_v29 = vmax.f32 %v330_v23, %v331_v27  ;;  %p764_p3 = por %p763_p2, %p762_p1 }
  0x39   : > { %v422_v24 = vsel %vm1011_vm6, 1.0, %v869_v5  ;;  %v327_v30 = vmax.f32 %v325_v26, %v326_v28  ;;  %v316_v37 = vsel %vm1011_vm6, %v284_v11, 0 }
  0x3a   : > { %v423_v25 = vadd.f32 %v422_v24, %v421_v20  ;;  %v333_v31 = vrot.slane %v332_v29, 1  ;;  %v368_v39 = vrot.slane %v316_v37, %v1019_v36  ;;  %v372_v40 = vrot.slane %v316_v37, %v1023_v38  ;;  %p765_p5 = pnand %p764_p3, %p758_p0 }
  0x3c   : > { %424 = vst.msk [vmem:[#allocation3] sm:$0x3] %vm994_vm0, %v423_v25  ;;  %v334_v32 = vmax.f32 %v332_v29, %v333_v31  ;;  %vm373_vm7 = vcmp.eq.s32.totalorder %v304_v4, %v368_v39  ;;  %vm374_vm8 = vcmp.eq.s32.totalorder %v304_v4, %v372_v40 }
  0x3d   : > { %v375_v45 = vsel %vm373_vm7, %v283_v10, 0.0  ;;  %v376_v49 = vsel %vm374_vm8, %v318_v13, 0.0 }
  0x3e   : > { %v337_v33 = vcombine.low %v327_v30, %v334_v32  ;;  %v377_v50 = vsel %vm320_vm1, %v375_v45, 0.0  ;;  %v384_v53 = vsel %vm320_vm1, %v376_v49, 0.0 }
  0x3f   : > { %v378_v56 = vrot.slane %v377_v50, 4  ;;  %v385_v59 = vrot.slane %v384_v53, 4 }
  0x40   : > { %v339_v34 = vsub.f32 %v283_v10, %v337_v33 }
  0x41   : > { %v379_v62 = vadd.f32 %v378_v56, %v377_v50  ;;  %v386_v0 = vadd.f32 %v385_v59, %v384_v53 }
  0x42   : > { %v340_v35 = vmul.f32 1.442695, %v339_v34 }
  0x43   : > { %v380_v1 = vrot.slane %v379_v62, 2  ;;  %v387_v2 = vrot.slane %v386_v0, 2  ;;  %v455_v26 = vld [vmem:[#allocation3] sm:$0x3] }
  0x44   : > { %721 = vpow2.f32 %v340_v35  ;;  %v460_v27 = vrot.slane %v455_v26, %v1019_v36  ;;  %v464_v28 = vrot.slane %v455_v26, %v1023_v38 }
  0x45   : > { %v381_v4 = vadd.f32 %v380_v1, %v379_v62  ;;  %v388_v5 = vadd.f32 %v387_v2, %v386_v0 }
  0x46   : > { %v467_v33 = vsel %vm440_vm9, %v460_v27, 0.0  ;;  %v468_v21 = vsel %vm440_vm9, %v464_v28, 0.0 }
  0x47   : > { %v382_v6 = vrot.slane %v381_v4, 1  ;;  %v389_v7 = vrot.slane %v388_v5, 1  ;;  %v469_v35 = vadd.f32 %v468_v21, %v467_v33 }
  0x49   : > { %v383_v11 = vadd.f32 %v382_v6, %v381_v4  ;;  %v390_v14 = vadd.f32 %v389_v7, %v388_v5 }
  0x51   : > { %v722_v41 = vpop.eup %721 }
  0x52   : > { %v343_v42 = vcombine.high %v722_v41, %v722_v41  ;;  %v345_v43 = vsel %vm320_vm1, %v722_v41, 0.0 }
  0x53   : > { %v346_v44 = vrot.slane %v345_v43, 4 }
  0x54   : > { %v352_v46 = vsel %vm320_vm1, %v343_v42, 0.0 }
  0x55   : > { %v347_v47 = vadd.f32 %v346_v44, %v345_v43  ;;  %v353_v48 = vrot.slane %v352_v46, 4 }
  0x57   : > { %v348_v51 = vrot.slane %v347_v47, 2  ;;  %v354_v52 = vadd.f32 %v353_v48, %v352_v46 }
  0x59   : > { %v349_v54 = vadd.f32 %v348_v51, %v347_v47  ;;  %v355_v55 = vrot.slane %v354_v52, 2 }
  0x5b   : > { %v350_v57 = vrot.slane %v349_v54, 1  ;;  %v356_v58 = vadd.f32 %v355_v55, %v354_v52 }
  0x5d   : > { %v351_v60 = vadd.f32 %v350_v57, %v349_v54  ;;  %v357_v61 = vrot.slane %v356_v58, 1 }
  0x5f   : > { %v358_v63 = vadd.f32 %v357_v61, %v356_v58  ;;  %723 = vlog2.f32 %v351_v60 }
  0x61   : > { %725 = vlog2.f32 %v358_v63 }
  0x6c   : > { %v724_v8 = vpop.eup %723 }
  0x6d   : > { %v360_v10 = vmul.f32 0.6931472, %v724_v8 }
  0x6e   : > { %v726_v12 = vpop.eup %725 }
  0x6f   : > { %v362_v13 = vmul.f32 0.6931472, %v726_v12  ;;  %v391_v15 = vadd.f32 %v360_v10, %v327_v30 }
  0x71   : > { %v392_v16 = vadd.f32 %v362_v13, %v334_v32  ;;  %v393_v17 = vsub.f32 %v391_v15, %v383_v11 }
  0x73   : > { %v394_v18 = vsub.f32 %v392_v16, %v390_v14 }
  0x75   : > { %v398_v19 = vcombine.low %v393_v17, %v394_v18 }
  0x77   : > { %v405_v20 = vrot.slane %v398_v19, %v1005_v9 }
  0x79   : > { %v412_v23 = vrot.slane %v405_v20, %v1005_v9 }
  0x7b   : > { %v414_v24 = vsel %vm1011_vm6, %v412_v23, 0.0 }
  0x7c   : > { %v415_v25 = vadd.f32 %v414_v24, %v395_v22 }
  0x7e   : > { %420 = vst.msk [vmem:[#allocation2] sm:$0x3] %vm994_vm0, %v415_v25 }
  0x85   : > { %v428_v29 = vld [vmem:[#allocation2] sm:$0x3] }
  0x86   : > { %v433_v30 = vrot.slane %v428_v29, %v1019_v36  ;;  %v437_v31 = vrot.slane %v428_v29, %v1023_v38 }
  0x88   : > { %v441_v32 = vsel %vm440_vm9, %v433_v30, 0.0  ;;  %v442_v9 = vsel %vm440_vm9, %v437_v31, 0.0 }
  0x89   : > { %v443_v34 = vadd.f32 %v442_v9, %v441_v32 }
  0x8b   : > { %444 = vadd.xlane.f32.xlu0 %v443_v34 }
  0x8f   : > { %470 = vadd.xlane.f32.xlu0 %v469_v35 }
 0x114   : > { %v445_v3 = vpop.xlane.xlu0 %444 }
 0x115   : > { %v446_v37 = vrot.slane %v445_v3, 4 }
 0x117   : > { %v447_v39 = vadd.f32 %v446_v37, %v445_v3 }
 0x118   : > { %v471_v40 = vpop.xlane.xlu0 %470 }
 0x119   : > { %v448_v41 = vrot.slane %v447_v39, 2  ;;  %v472_v36 = vrot.slane %v471_v40, 4 }
 0x11b   : > { %v473_v38 = vadd.f32 %v472_v36, %v471_v40  ;;  %v449_v42 = vadd.f32 %v448_v41, %v447_v39 }
 0x11d   : > { %v474_v43 = vrot.slane %v473_v38, 2  ;;  %v450_v44 = vrot.slane %v449_v42, 1 }
 0x11f   : > { %v475_v45 = vadd.f32 %v474_v43, %v473_v38  ;;  %v451_v46 = vadd.f32 %v450_v44, %v449_v42 }
 0x121   : > { %646 = vpush %v451_v46  ;;  %v476_v47 = vrot.slane %v475_v45, 1 }
 0x123   : > { %v477_v48 = vadd.f32 %v476_v47, %v475_v45 }
 0x125   : > { %648 = vpush %v477_v48 }
 0x152   : > { %s647_s25 = spop %646 }
 0x153   : > { %v453_v49 = vstv %s647_s25 }
 0x154   : > { %454 = vst [vmem:[%s256_s11] sm:$0x1] %v453_v49 }
 0x155   : > { %768 = shalt.err (!%p765_p5)
}
 0x156   : > { %s769_s8 = scalar_lea.hbm %s1051_s23, 16  ;;  %s773_s20 = scalar_lea.hbm %s1128_s3, 32 }
 0x157   : > { %p770_p6 = scmp.ne.s32.totalorder %s1051_s23, %s769_s8  ;;  %p774_p4 = scmp.lt.s32.totalorder %s1051_s23, %s1128_s3 }
 0x158   : > { %p775_p13 = scmp.lt.s32.totalorder %s773_s20, %s769_s8 }
 0x159   : > { %p771_p7 = pnand %p770_p6, %p949_p9 }
 0x15a   : > { %p776_p12 = por %p775_p13, %p774_p4 }
 0x15b   : > { %p772_p10 = pneg %p771_p7 }
 0x15d   : > { %p777_p8 = pnand %p776_p12, %p772_p10 }
 0x15f   : > { %780 = shalt.err (!%p777_p8)
}
 0x160   : > { %652 = dma.vmem_to_hbm [thread:$0]  (%p949_p9), %s1053_s12, 16, %s1051_s23, %s482_s30  }
 0x161   : > { %s649_s5 = spop %648  ;;  %s509_s7 = scalar_lea.hbm %s1129_s4, %s641_s10 }
 0x162   : > { %v479_v50 = vstv %s649_s5  ;;  %s486_s8 = scalar_lea.sflag [#allocation9], %s984_s24  ;;  %s781_s9 = scalar_lea.vmem %s1055_s14, 16 }
 0x163   : > { %480 = vst [vmem:[%s262_s13] sm:$0x1] %v479_v50  ;;  %p782_p11 = scmp.ne.s32.totalorder %s1055_s14, %s781_s9  ;;  %s872_s11 = smov [#allocation8]  }
 0x164   : > { %s785_s20 = sshll.u32 %s872_s11, 4  ;;  %s786_s20 = int_to_ptr.vmem [resolvable:$false] %s785_s20 }
 0x165   : > { %p783_p0 = pnand %p782_p11, %p949_p9  ;;  %s787_s21 = scalar_lea.vmem %s786_s20, 32 }
 0x166   : > { %p788_p2 = scmp.lt.s32.totalorder %s1055_s14, %s786_s20  ;;  %p789_p3 = scmp.lt.s32.totalorder %s787_s21, %s781_s9 }
 0x167   : > { %p784_p1 = pneg %p783_p0 }
 0x168   : > { %p790_p5 = por %p789_p3, %p788_p2 }
 0x16a   : > { %p791_p6 = pnand %p790_p5, %p784_p1 }
 0x16c   : > { %794 = shalt.err (!%p791_p6)
}
 0x16d   : > { %s795_s18 = scalar_lea.hbm %s509_s7, 16  ;;  %s799_s12 = scalar_lea.hbm %s1129_s4, 32 }
 0x16e   : > { %p796_p7 = scmp.ne.s32.totalorder %s509_s7, %s795_s18  ;;  %p800_p13 = scmp.lt.s32.totalorder %s509_s7, %s1129_s4 }
 0x16f   : > { %p801_p12 = scmp.lt.s32.totalorder %s799_s12, %s795_s18 }
 0x170   : > { %p797_p10 = pnand %p796_p7, %p949_p9 }
 0x171   : > { %p802_p8 = por %p801_p12, %p800_p13 }
 0x172   : > { %p798_p4 = pneg %p797_p10 }
 0x174   : > { %p803_p11 = pnand %p802_p8, %p798_p4 }
 0x176   : > { %806 = shalt.err (!%p803_p11)
}
 0x177   : > { %653 = dma.vmem_to_hbm [thread:$0]  (%p949_p9), %s1055_s14, 16, %s509_s7, %s486_s8  }
 0x178 PF: > { %s523_s30 = sand.u32 1, %s845_s15   ;;  %p1139_p0 = scmp.ne.s32.totalorder %s1133_s29, 0 }
 0x179   : > { %p1140_p1 = scmp.ge.s32.totalorder %s865_s19, 2  ;;  %s524_s25 = scalar_lea.sflag [#allocation6], %s523_s30 }
 0x17b   : > { %p661_p2 = pnand %p1140_p1, %p1139_p0 }
 0x17d   : > { %p662_p3 = pneg %p661_p2 }
 0x17f   : > { %836 = dma.done.wait (%p662_p3), %s524_s25, 16  }
 0x180   : > { %838 = vsyncadd (%p662_p3), %s524_s25, 4294967280  ;;  %s532_s5 = scalar_lea.sflag [#allocation9], %s523_s30 }
 0x181   : > { %840 = dma.done.wait (%p662_p3), %s532_s5, 16  }
 0x182   : > { %842 = vsyncadd (%p662_p3), %s532_s5, 4294967280  ;;  %s24_s19 = sadd.s32 1, %s865_s19   ;;  %s1141_s15 = smov %s849_s16 }
 0x183   : > { %p21_p5 = scmp.ge.s32.totalorder %s24_s19, 4   ;;  %s1142_s16 = smov %s853_s17 }
 0x184   : > { %s1143_s17 = smov %s954_s28  ;;  %s1144_s18 = smov %s861_s2 }
 0x185   : > { %s1145_s2 = smov %s1147_s22  ;;  %23 = sbr.rel (!%p21_p5) target bundleno = 8 (0x8), region = 105 }
 0x18a   :  { %536 = vsyncpa [#allocation5], 1 }
 0x18b   :  { %538 = vsyncpa [#allocation5 + $0x1], 1 }
 0x18c   :  { %539 = vsyncpa [#allocation6], 1 }
 0x18d   :  { %541 = vsyncpa [#allocation6 + $0x1], 1 }
 0x18e   :  { %542 = vsyncpa [#allocation9], 1 }
 0x18f   :  { %544 = vsyncpa [#allocation9 + $0x1], 1 }

</bundles_post_ra>
